<compile_context>
chip_gen: v7x
topology: tpu7x:2x2x1
jax: 0.10.0
libtpu: 0.0.40
codegen_flags: <defaults>
</compile_context>

<pallas_src>
import functools

import jax
import jax.numpy as jnp
from jax.experimental import pallas as pl
from jax.experimental.pallas import tpu as pltpu

TEMPERATURE = 0.1  # opt.diva_instdiscr_temperature (deterministic, in-script)


def _round_up(a, m):
    return (a + m - 1) // m * m


def _invariant_spread_kernel(x_rows_ref, x_cols_ref, o_ref, *, n_valid, half, inv_t):
    """Per row-block contribution of the invariant-spread loss.

    x_rows_ref : (tm, D)      f32  -- row tile of (padded) x
    x_cols_ref : (n_pad, D)   f32  -- full (padded) x, resident across steps
    o_ref      : (tm, 1)      f32  -- per-row lnPmt_i + lnPon_i
    """
    tm = x_rows_ref.shape[0]
    n_cols = x_cols_ref.shape[0]
    row_base = pl.program_id(0) * tm

    xr = x_rows_ref[...]
    xc = x_cols_ref[...]

    # (tm, n_cols) similarity tile on the MXU; contracting dim 1 of both
    # operands avoids materializing x.T through the XLU.
    sims = jax.lax.dot_general(
        xr, xc,
        dimension_numbers=(((1,), (1,)), ((), ())),
        preferred_element_type=jnp.float32,
    ) * inv_t

    row_ids = row_base + jax.lax.broadcasted_iota(jnp.int32, (tm, n_cols), 0)
    col_ids = jax.lax.broadcasted_iota(jnp.int32, (tm, n_cols), 1)
    valid_col = col_ids < n_valid
    off_diag = jnp.logical_and(valid_col, col_ids != row_ids)

    # Per-row max over off-diagonal valid entries: cancels exactly in every
    # ratio below but keeps exp() in range for any input scale / temperature.
    m = jnp.max(jnp.where(off_diag, sims, -jnp.inf), axis=1, keepdims=True)   # (tm,1)
    e = jnp.where(off_diag, jnp.exp(sims - m), 0.0)        # scaled all_prob   (tm,n)
    d = jnp.sum(e, axis=1, keepdims=True)                  # scaled all_div    (tm,1)
    logd = jnp.log(d)

    # Positive pair column: j = (i + N/2) mod N.
    pair_ids = jnp.where(row_ids < half, row_ids + half, row_ids - half)
    is_pair = col_ids == pair_ids
    s_pair = jnp.sum(jnp.where(is_pair, sims, 0.0), axis=1, keepdims=True)    # (tm,1)
    pos_e = jnp.sum(jnp.where(is_pair, e, 0.0), axis=1, keepdims=True)        # (tm,1)

    # lnPmt_i = log(pos_i / d_i)                = (s_pair - m) - log d
    # sum_{j!=i} log(1 - a_ij/d_i)              = sum_j log(d - e_ij) - n_cols*log d
    #   (zero entries (diag / padding) contribute log(d) - log(d) = 0)
    # lnPon_i = that sum - log(1 - pos_i/d_i)
    #         = sum_j log(d - e_ij) - (n_cols-1)*log d - log(d - pos_e)
    sum_log_dme = jnp.sum(jnp.log(d - e), axis=1, keepdims=True)
    contrib = (s_pair - m) + sum_log_dme \
        - jnp.float32(n_cols) * logd - jnp.log(d - pos_e)

    o_ref[...] = contrib


def invariant_spread_loss(head_1, head_2, temperature=TEMPERATURE):
    """Forward pass of the invariant-spread criterion (loss scalar)."""
    bs = head_1.shape[0]
    n = 2 * bs
    x = jnp.concatenate([head_1, head_2], axis=0).astype(jnp.float32)   # (n, D)
    d_feat = x.shape[1]

    # Row tile: multiple of 8, sized so the (tm, n_pad) f32 temporaries stay
    # well inside the default scoped-VMEM budget on v5e/v6e/v7x.
    if n <= 256:
        tm = _round_up(n, 8)
    else:
        budget_rows = (6 * 1024 * 1024) // (4 * 4 * _round_up(n, 8))
        tm = max(8, min(256, (budget_rows // 8) * 8))
    n_pad = _round_up(n, tm)
    num_blocks = n_pad // tm

    x_pad = x if n_pad == n else jnp.pad(x, ((0, n_pad - n), (0, 0)))

    kernel = functools.partial(
        _invariant_spread_kernel, n_valid=n, half=bs, inv_t=1.0 / temperature)

    # TODO(synk): for very large N, stream column tiles in two passes instead of
    # keeping the full (n_pad, D) operand and (tm, n_pad) temporaries resident.
    contrib = pl.pallas_call(
        kernel,
        out_shape=jax.ShapeDtypeStruct((n_pad, 1), jnp.float32),
        grid_spec=pltpu.PrefetchScalarGridSpec(
            num_scalar_prefetch=0,
            grid=(num_blocks,),
            in_specs=[
                pl.BlockSpec((tm, d_feat), lambda i: (i, 0)),      # row tile
                pl.BlockSpec((n_pad, d_feat), lambda i: (0, 0)),   # full x (resident)
            ],
            out_specs=pl.BlockSpec((tm, 1), lambda i: (i, 0)),
        ),
        compiler_params=pltpu.CompilerParams(
            dimension_semantics=("parallel",)),
    )(x_pad, x_pad)

    # Padded rows are sliced away; normalization matches the reference (/ x.shape[0]).
    return -jnp.sum(contrib[:n, 0]) / n


def _reference_loss(head_1, head_2, temperature=TEMPERATURE):
    """Straightforward JAX port of the PyTorch forward (for verification)."""
    bs = head_1.shape[0]
    x = jnp.concatenate([head_1, head_2], axis=0).astype(jnp.float32)
    n = 2 * bs
    reordered = jnp.concatenate([x[bs:], x[:bs]], axis=0)
    pos = jnp.exp(jnp.sum(x * reordered, axis=1) / temperature)
    all_prob = jnp.exp(x @ x.T / temperature) * (1.0 - jnp.eye(n, dtype=jnp.float32))
    all_div = jnp.sum(all_prob, axis=1)
    lnPmt = pos / all_div
    lnPon = jnp.log(1.0 - all_prob / all_div[:, None])
    lnPon = jnp.sum(lnPon, axis=1) - jnp.log(1.0 - lnPmt)
    return -(jnp.sum(jnp.log(lnPmt)) + jnp.sum(lnPon)) / n


if __name__ == "__main__":
    key = jax.random.PRNGKey(0)
    k1, k2 = jax.random.split(key)
    bs_half, dim = 4, 32            # opt.bs = 8 -> head_1/head_2 each (4, 32)
    head_1 = jax.random.normal(k1, (bs_half, dim), dtype=jnp.float32)
    head_2 = jax.random.normal(k2, (bs_half, dim), dtype=jnp.float32)
    # embeddings are typically L2-normalized before this criterion
    head_1 = head_1 / jnp.linalg.norm(head_1, axis=1, keepdims=True)
    head_2 = head_2 / jnp.linalg.norm(head_2, axis=1, keepdims=True)

    loss = jax.jit(invariant_spread_loss)(head_1, head_2)
    jax.block_until_ready(loss)
    assert loss.shape == () and jnp.isfinite(loss)

    ref = _reference_loss(head_1, head_2)
    assert jnp.allclose(loss, ref, rtol=1e-3, atol=1e-3), (loss, ref)

    print("KERNEL_OK")
</pallas_src>

<mosaic_0001>
module attributes {stable_mosaic.version = 11 : i64} {
  func.func @_invariant_spread_kernel(%arg0: i32, %arg1: memref<8x32xf32, #tpu.memory_space<vmem>>, %arg2: memref<8x32xf32, #tpu.memory_space<vmem>>, %arg3: memref<8x1xf32, #tpu.memory_space<vmem>>) attributes {dimension_semantics = [#tpu.dimension_semantics<parallel>], iteration_bounds = array<i64: 1>, scalar_prefetch = 0 : i64, scratch_operands = 0 : i64, tpu.core_type = #tpu.core_type<tc>, window_params = [{transform_indices = @transform_0, window_bounds = array<i64: 8, 32>}, {pipeline_mode = #tpu.pipeline_mode<synchronous>, transform_indices = @transform_1, window_bounds = array<i64: 8, 32>}, {transform_indices = @transform_2, window_bounds = array<i64: 8, 1>}]} {
    %c8_i32 = arith.constant 8 : i32
    %0 = arith.muli %arg0, %c8_i32 : i32
    %c0 = arith.constant 0 : index
    %c0_0 = arith.constant 0 : index
    %1 = vector.load %arg1[%c0, %c0_0] : memref<8x32xf32, #tpu.memory_space<vmem>>, vector<8x32xf32>
    %c0_1 = arith.constant 0 : index
    %c0_2 = arith.constant 0 : index
    %2 = vector.load %arg2[%c0_1, %c0_2] : memref<8x32xf32, #tpu.memory_space<vmem>>, vector<8x32xf32>
    %cst = arith.constant dense<0.000000e+00> : vector<8x8xf32>
    %3 = tpu.matmul %1, %2, %cst {dimension_numbers = #tpu.dot_dimension_numbers<[1], [1], [0], [0], [0, 0, 1, 0], [], []>} : vector<8x32xf32>, vector<8x32xf32>, vector<8x8xf32> -> vector<8x8xf32>
    %cst_3 = arith.constant 1.000000e+01 : f32
    %4 = vector.broadcast %cst_3 : f32 to vector<8x8xf32>
    %5 = arith.mulf %3, %4 : vector<8x8xf32>
    %6 = tpu.iota {dimensions = array<i32: 0>} : vector<8x8xi32>
    %7 = vector.broadcast %0 : i32 to vector<8x8xi32>
    %8 = arith.addi %7, %6 : vector<8x8xi32>
    %9 = tpu.iota {dimensions = array<i32: 1>} : vector<8x8xi32>
    %c8_i32_4 = arith.constant 8 : i32
    %10 = vector.broadcast %c8_i32_4 : i32 to vector<8x8xi32>
    %11 = arith.cmpi slt, %9, %10 : vector<8x8xi32>
    %12 = arith.cmpi ne, %9, %8 : vector<8x8xi32>
    %13 = arith.andi %11, %12 : vector<8x8xi1>
    %cst_5 = arith.constant 0xFF800000 : f32
    %14 = vector.broadcast %cst_5 : f32 to vector<8x8xf32>
    %15 = arith.select %13, %5, %14 : vector<8x8xi1>, vector<8x8xf32>
    %cst_6 = arith.constant dense<0xFF800000> : vector<8xf32>
    %16 = vector.multi_reduction <maximumf>, %15, %cst_6 [1] : vector<8x8xf32> to vector<8xf32>
    %17 = vector.shape_cast %16 : vector<8xf32> to vector<8x1xf32>
    %18 = vector.broadcast %17 : vector<8x1xf32> to vector<8x8xf32>
    %19 = arith.subf %5, %18 : vector<8x8xf32>
    %20 = math.exp %19 : vector<8x8xf32>
    %cst_7 = arith.constant 0.000000e+00 : f32
    %21 = vector.broadcast %cst_7 : f32 to vector<8x8xf32>
    %22 = arith.select %13, %20, %21 : vector<8x8xi1>, vector<8x8xf32>
    %cst_8 = arith.constant dense<0.000000e+00> : vector<8xf32>
    %23 = vector.multi_reduction <add>, %22, %cst_8 [1] : vector<8x8xf32> to vector<8xf32>
    %24 = vector.shape_cast %23 : vector<8xf32> to vector<8x1xf32>
    %25 = math.log %24 : vector<8x1xf32>
    %c4_i32 = arith.constant 4 : i32
    %26 = vector.broadcast %c4_i32 : i32 to vector<8x8xi32>
    %27 = arith.cmpi slt, %8, %26 : vector<8x8xi32>
    %c4_i32_9 = arith.constant 4 : i32
    %28 = vector.broadcast %c4_i32_9 : i32 to vector<8x8xi32>
    %29 = arith.addi %8, %28 : vector<8x8xi32>
    %c4_i32_10 = arith.constant 4 : i32
    %30 = vector.broadcast %c4_i32_10 : i32 to vector<8x8xi32>
    %31 = arith.subi %8, %30 : vector<8x8xi32>
    %32 = arith.select %27, %29, %31 : vector<8x8xi1>, vector<8x8xi32>
    %33 = arith.cmpi eq, %9, %32 : vector<8x8xi32>
    %cst_11 = arith.constant 0.000000e+00 : f32
    %34 = vector.broadcast %cst_11 : f32 to vector<8x8xf32>
    %35 = arith.select %33, %5, %34 : vector<8x8xi1>, vector<8x8xf32>
    %cst_12 = arith.constant dense<0.000000e+00> : vector<8xf32>
    %36 = vector.multi_reduction <add>, %35, %cst_12 [1] : vector<8x8xf32> to vector<8xf32>
    %37 = vector.shape_cast %36 : vector<8xf32> to vector<8x1xf32>
    %cst_13 = arith.constant 0.000000e+00 : f32
    %38 = vector.broadcast %cst_13 : f32 to vector<8x8xf32>
    %39 = arith.select %33, %22, %38 : vector<8x8xi1>, vector<8x8xf32>
    %cst_14 = arith.constant dense<0.000000e+00> : vector<8xf32>
    %40 = vector.multi_reduction <add>, %39, %cst_14 [1] : vector<8x8xf32> to vector<8xf32>
    %41 = vector.shape_cast %40 : vector<8xf32> to vector<8x1xf32>
    %42 = vector.broadcast %24 : vector<8x1xf32> to vector<8x8xf32>
    %43 = arith.subf %42, %22 : vector<8x8xf32>
    %44 = math.log %43 : vector<8x8xf32>
    %cst_15 = arith.constant dense<0.000000e+00> : vector<8xf32>
    %45 = vector.multi_reduction <add>, %44, %cst_15 [1] : vector<8x8xf32> to vector<8xf32>
    %46 = vector.shape_cast %45 : vector<8xf32> to vector<8x1xf32>
    %47 = arith.subf %37, %17 : vector<8x1xf32>
    %48 = arith.addf %47, %46 : vector<8x1xf32>
    %cst_16 = arith.constant 8.000000e+00 : f32
    %49 = vector.broadcast %cst_16 : f32 to vector<8x1xf32>
    %50 = arith.mulf %49, %25 : vector<8x1xf32>
    %51 = arith.subf %48, %50 : vector<8x1xf32>
    %52 = arith.subf %24, %41 : vector<8x1xf32>
    %53 = math.log %52 : vector<8x1xf32>
    %54 = arith.subf %51, %53 : vector<8x1xf32>
    %c0_17 = arith.constant 0 : index
    %c0_18 = arith.constant 0 : index
    %55 = vector.load %arg3[%c0_17, %c0_18] : memref<8x1xf32, #tpu.memory_space<vmem>>, vector<8x1xf32>
    tpu.vector_store %arg3[%c0_17, %c0_18], %54 {strides = array<i32>} : memref<8x1xf32, #tpu.memory_space<vmem>>, vector<8x1xf32>,
    return
  }
  func.func @transform_0(%arg0: i32) -> (i32, i32) {
    %c0_i32 = arith.constant 0 : i32
    %c0_i32_0 = arith.constant 0 : i32
    return %arg0, %c0_i32 : i32, i32
  }
  func.func @transform_1(%arg0: i32) -> (i32, i32) {
    %c0_i32 = arith.constant 0 : i32
    %c0_i32_0 = arith.constant 0 : i32
    %c0_i32_1 = arith.constant 0 : i32
    return %c0_i32, %c0_i32_0 : i32, i32
  }
  func.func @transform_2(%arg0: i32) -> (i32, i32) {
    %c0_i32 = arith.constant 0 : i32
    %c0_i32_0 = arith.constant 0 : i32
    return %arg0, %c0_i32 : i32, i32
  }
}

</mosaic_0001>

<bundles_post_ra>
// kernel: invariant_spread_loss.1
= control target key start
LH: loop header
LB: loop body
LE: loop exit
PB: predicated region body
PF: predicated region fallthrough
CT: control target
= control target key end

     0   :  { %vm14_vm0 = vcmask 261120   ;;  %v168_v0 = vmov 0.0   ;;  %vm169_vm1 = vmmov 0   ;;  %v92_v3 = vlaneseq  ;;  %s201_s1 = inlined_call_operand.vmem [shape: f32[8,32], index: 1, kind: input, shape index: {}, may-alias: {0,1}]   ;;  %s202_s0 = inlined_call_operand.vmem [shape: f32[8,32], index: 0, kind: input, shape index: {}, may-alias: {0,1}]   ;;  %s203_s2 = inlined_call_operand.vmem [shape: f32[8,1], index: 2, kind: output, shape index: {}]  }
   0x1   :  { %153 = vmatprep.subr.mxu0 %v168_v0  ;;  %v13_v1 = vld [vmem:[%s201_s1] sm:$0xff]  ;;  %155 = vmatprep.mubr.msk.f32.mxu0 %vm169_vm1, %v168_v0  ;;  %vm102_vm7 = vcmask 64512   ;;  %vm142_vm8 = vcmask 7168  }
   0x2   :  { %154 = vmatpush3.xpose.msk.msra.mxu0 %vm14_vm0, %v13_v1  ;;  %v12_v2 = vld [vmem:[%s202_s0] sm:$0xff]  ;;  %v93_v4 = vshrl.u32 %v92_v3, 7  ;;  %v97_v5 = vand.u32 127, %v92_v3 }
   0x4   :  { %v116_v6 = vadd.s32 4, %v93_v4  ;;  %v150_v7 = vadd.s32 4294967292, %v93_v4  ;;  %vm115_vm2 = vcmp.lt.s32.totalorder %v93_v4, 4  ;;  %vm98_vm4 = vcmp.lt.s32.totalorder %v97_v5, 8 }
   0x5   :  { %156 = vmatmul.mubr.msk.f32.vlgmr.msra.gmra.mrb[0].mxu0 %vm14_vm0, %v12_v2  ;;  %vm99_vm5 = vcmp.ne.s32.totalorder %v97_v5, %v93_v4 }
   0x6   :  { %v118_v8 = vsel %vm115_vm2, %v116_v6, %v150_v7  ;;  %vm100_vm6 = vmand %vm98_vm4, %vm99_vm5 }
   0x7   :  { %vm119_vm3 = vcmp.eq.s32.totalorder %v97_v5, %v118_v8 }
  0xd8   :  { %v87_v9 = vpop.f32.mrb[0].mxu0 }
  0xd9   :  { %v91_v10 = vmul.f32 10.0, %v87_v9  ;;  %v157_v11 = vpop.f32.mrb[1].mxu0 }
  0xdb   :  { %v101_v12 = vsel %vm100_vm6, %v91_v10, -inf  ;;  %v120_v22 = vsel %vm119_vm3, %v91_v10, 0.0 }
  0xdc   :  { %v103_v13 = vsel %vm102_vm7, %v101_v12, -inf  ;;  %v121_v23 = vsel %vm102_vm7, %v120_v22, 0.0 }
  0xdd   :  { %104 = vmax.xlane.f32.xlu0 %v103_v13 }
 0x16a   :  { %v105_v14 = vpop.xlane.xlu0 %104 }
 0x16b   :  { %v106_v15 = vsub.f32 %v91_v10, %v105_v14 }
 0x16d   :  { %v107_v16 = vmul.f32 1.442695, %v106_v15 }
 0x16f   :  { %160 = vpow2.f32 %v107_v16 }
 0x179   :  { %v161_v17 = vpop.eup %160 }
 0x17a   :  { %v109_v18 = vsel %vm100_vm6, %v161_v17, 0.0 }
 0x17b   :  { %v110_v19 = vsel %vm102_vm7, %v109_v18, 0.0  ;;  %v124_v20 = vsel %vm119_vm3, %v109_v18, 0.0 }
 0x17c   :  { %111 = vadd.xlane.f32.xlu0 %v110_v19  ;;  %v125_v21 = vsel %vm102_vm7, %v124_v20, 0.0 }
 0x17d   :  { %126 = vadd.xlane.f32.xlu1 %v125_v21 }
 0x181   :  { %122 = vadd.xlane.f32.xlu1 %v121_v23 }
 0x209   :  { %v112_v24 = vpop.xlane.xlu0 %111 }
 0x20a   :  { %v128_v25 = vsub.f32 %v112_v24, %v109_v18  ;;  %v127_v29 = vpop.xlane.xlu1 %126 }
 0x20b   :  { %v138_v30 = vsub.f32 %v112_v24, %v127_v29 }
 0x20c   :  { %162 = vlog2.f32 %v128_v25 }
 0x20d   :  { %164 = vlog2.f32 %v112_v24 }
 0x20e   :  { %166 = vlog2.f32 %v138_v30  ;;  %v123_v32 = vpop.xlane.xlu1 %122 }
 0x20f   :  { %v134_v34 = vsub.f32 %v123_v32, %v105_v14 }
 0x216   :  { %v163_v26 = vpop.eup %162 }
 0x217   :  { %v130_v27 = vmul.f32 0.6931472, %v163_v26  ;;  %v165_v31 = vpop.eup %164 }
 0x218   :  { %v114_v33 = vmul.f32 0.6931472, %v165_v31  ;;  %v167_v35 = vpop.eup %166 }
 0x219   :  { %v131_v28 = vsel %vm102_vm7, %v130_v27, 0.0  ;;  %v140_v39 = vmul.f32 0.6931472, %v167_v35 }
 0x21a   :  { %132 = vadd.xlane.f32.xlu0 %v131_v28  ;;  %v136_v38 = vmul.f32 8.0, %v114_v33 }
 0x2a7   :  { %v133_v36 = vpop.xlane.xlu0 %132 }
 0x2a8   :  { %v135_v37 = vadd.f32 %v134_v34, %v133_v36 }
 0x2aa   :  { %v137_v40 = vsub.f32 %v135_v37, %v136_v38 }
 0x2ac   :  { %v141_v41 = vsub.f32 %v137_v40, %v140_v39 }
 0x2ae   :  { %143 = vst.msk [vmem:[%s203_s2] sm:$0xff] %vm142_vm8, %v141_v41 }

</bundles_post_ra>
